<compile_context>
chip_gen: v7x
topology: tpu7x:2x2x1
jax: 0.10.0
libtpu: 0.0.40
codegen_flags: <defaults>
</compile_context>

<pallas_src>
import math

import jax
import jax.numpy as jnp
from jax.experimental import pallas as pl
from jax.experimental.pallas import tpu as pltpu


def _round_up(x, m):
    return (x + m - 1) // m * m


def channel_mix_kernel(x_ref, xx_ref, mk_ref, mr_ref, kw_ref, rw_ref, vw_ref,
                       o_ref, acc_ref):
    # Grid: (row_tiles [parallel], hidden_chunks [arbitrary, innermost]).
    h = pl.program_id(1)

    x = x_ref[...]        # (TM, Cp) f32
    xx = xx_ref[...]      # (TM, Cp) f32, time-shifted rows (precomputed in wrapper)
    d = x - xx            # hoisted: xk = xx + d*mk, xr = xx + d*mr

    @pl.when(h == 0)
    def _():
        acc_ref[...] = jnp.zeros_like(acc_ref)

    # Key/value path for this hidden chunk: relu(xk @ Wk[:, h])^2 @ Wv[h, :]
    xk = (xx + d * mk_ref[...]).astype(jnp.bfloat16)
    k = jnp.dot(xk, kw_ref[...], preferred_element_type=jnp.float32)   # (TM, TH)
    k = jnp.square(jnp.maximum(k, 0.0)).astype(jnp.bfloat16)
    acc_ref[...] += jnp.dot(k, vw_ref[...], preferred_element_type=jnp.float32)

    @pl.when(h == pl.num_programs(1) - 1)
    def _():
        xr = (xx + d * mr_ref[...]).astype(jnp.bfloat16)
        r = jax.nn.sigmoid(
            jnp.dot(xr, rw_ref[...], preferred_element_type=jnp.float32))
        o_ref[...] = (r * acc_ref[...]).astype(o_ref.dtype)
    # TODO(synk): key_norm=True (LayerNorm over H) branch not implemented; the
    # module default key_norm=False matches this kernel.


def tem_rwkv_channel_mix(x, mix_k, mix_r, w_key, w_recept, w_value,
                         *, tm=256, th=512):
    """x: (B,T,C) f32; mix_*: (1,C); w_key: (C,H); w_recept: (C,C); w_value: (H,C)."""
    B, T, C = x.shape
    H = w_key.shape[1]
    R = B * T

    # time_shift (ZeroPad2d((0,0,1,-1))) precomputed so fused rows are independent.
    xx = jnp.concatenate([jnp.zeros((B, 1, C), x.dtype), x[:, :-1, :]], axis=1)

    # Lane-dense padding: channels / hidden -> multiples of 128, rows -> TM.
    Cp = _round_up(C, 128)
    Hp = _round_up(H, 128)
    tm = min(tm, _round_up(R, 8))
    Rp = _round_up(R, tm)
    th = min(th, Hp)
    if Hp % th:
        th = math.gcd(Hp, th)   # multiple of 128 that divides Hp

    f32, bf16 = jnp.float32, jnp.bfloat16
    xp = jnp.pad(x.reshape(R, C).astype(f32), ((0, Rp - R), (0, Cp - C)))
    xxp = jnp.pad(xx.reshape(R, C).astype(f32), ((0, Rp - R), (0, Cp - C)))
    mkp = jnp.pad(mix_k.reshape(1, C).astype(f32), ((0, 0), (0, Cp - C)))
    mrp = jnp.pad(mix_r.reshape(1, C).astype(f32), ((0, 0), (0, Cp - C)))
    # Weights cast to bf16 once (MXU-native; halves their DMA/VMEM footprint),
    # zero-padded so padded lanes contribute exactly zero.
    wk = jnp.pad(w_key.astype(bf16), ((0, Cp - C), (0, Hp - H)))
    wr = jnp.pad(w_recept.astype(bf16), ((0, Cp - C), (0, Cp - C)))
    wv = jnp.pad(w_value.astype(bf16), ((0, Hp - H), (0, Cp - C)))

    grid = (Rp // tm, Hp // th)

    try:
        # ~75% of physical VMEM: ~96 MiB v5e/v6e, ~48 MiB v7x.
        vmem_limit = int(pltpu.get_tpu_info().vmem_capacity_bytes * 3 // 4)
    except Exception:
        vmem_limit = 48 * 1024 * 1024

    out = pl.pallas_call(
        channel_mix_kernel,
        out_shape=jax.ShapeDtypeStruct((Rp, Cp), x.dtype),
        grid_spec=pltpu.PrefetchScalarGridSpec(
            num_scalar_prefetch=0,
            grid=grid,
            in_specs=[
                pl.BlockSpec((tm, Cp), lambda i, h: (i, 0)),   # x rows
                pl.BlockSpec((tm, Cp), lambda i, h: (i, 0)),   # shifted rows
                pl.BlockSpec((1, Cp), lambda i, h: (0, 0)),    # mix_k
                pl.BlockSpec((1, Cp), lambda i, h: (0, 0)),    # mix_r
                pl.BlockSpec((Cp, th), lambda i, h: (0, h)),   # Wk chunk
                pl.BlockSpec((Cp, Cp), lambda i, h: (0, 0)),   # Wr (grid-invariant)
                pl.BlockSpec((th, Cp), lambda i, h: (h, 0)),   # Wv chunk
            ],
            out_specs=pl.BlockSpec((tm, Cp), lambda i, h: (i, 0)),
            scratch_shapes=[pltpu.VMEM((tm, Cp), jnp.float32)],   # kv accumulator
        ),
        compiler_params=pltpu.CompilerParams(
            dimension_semantics=("parallel", "arbitrary"),
            vmem_limit_bytes=vmem_limit),
    )(xp, xxp, mkp, mrp, wk, wr, wv)

    return out[:R, :C].reshape(B, T, C)


def reference(x, mix_k, mix_r, w_key, w_recept, w_value):
    B, T, C = x.shape
    xx = jnp.concatenate([jnp.zeros((B, 1, C), x.dtype), x[:, :-1, :]], axis=1)
    xk = x * mix_k[None] + xx * (1.0 - mix_k[None])
    xr = x * mix_r[None] + xx * (1.0 - mix_r[None])
    k = jnp.square(jnp.maximum(xk @ w_key, 0.0))
    kv = k @ w_value
    return jax.nn.sigmoid(xr @ w_recept) * kv


if __name__ == "__main__":
    # Module hyper-parameters (synthetic, deterministic init).
    n_embd = 32
    n_layer = 4
    layer_id = 1
    hidden_rate = 4
    hidden_sz = hidden_rate * n_embd

    B, T, C, Hd = 2, 8, n_embd, hidden_sz

    # 'fancy' init: (i / n_embd) ** (1 - layer_id/n_layer)
    ratio_1_to_almost0 = 1.0 - layer_id / n_layer
    base = jnp.arange(n_embd, dtype=jnp.float32) / n_embd
    spatial_mix = jnp.power(base, ratio_1_to_almost0).reshape(1, n_embd)
    mix_k = spatial_mix
    mix_r = spatial_mix

    key = jax.random.PRNGKey(0)
    kx, kk, kr, kv = jax.random.split(key, 4)
    x = jax.random.normal(kx, (B, T, C), dtype=jnp.float32)
    # Weights stored (in, out); scaled like Linear init ~ 1/sqrt(fan_in).
    w_key = jax.random.normal(kk, (C, Hd), dtype=jnp.float32) * (1.0 / jnp.sqrt(C))
    w_recept = jax.random.normal(kr, (C, C), dtype=jnp.float32) * (1.0 / jnp.sqrt(C))
    w_value = jax.random.normal(kv, (Hd, C), dtype=jnp.float32) * (1.0 / jnp.sqrt(Hd))

    out = tem_rwkv_channel_mix(x, mix_k, mix_r, w_key, w_recept, w_value)
    out = jax.block_until_ready(out)

    ref = reference(x, mix_k, mix_r, w_key, w_recept, w_value)
    assert out.shape == (B, T, C)
    # bf16 matmuls (relu^2 amplifies error) vs f32 reference -> relaxed tolerance.
    assert jnp.allclose(out, ref, atol=5e-2, rtol=5e-2)

    print("KERNEL_OK")
</pallas_src>

<mosaic_0001>
module attributes {stable_mosaic.version = 11 : i64} {
  func.func @channel_mix_kernel(%arg0: i32, %arg1: i32, %arg2: memref<16x128xf32, #tpu.memory_space<vmem>>, %arg3: memref<16x128xf32, #tpu.memory_space<vmem>>, %arg4: memref<1x128xf32, #tpu.memory_space<vmem>>, %arg5: memref<1x128xf32, #tpu.memory_space<vmem>>, %arg6: memref<128x128xbf16, #tpu.memory_space<vmem>>, %arg7: memref<128x128xbf16, #tpu.memory_space<vmem>>, %arg8: memref<128x128xbf16, #tpu.memory_space<vmem>>, %arg9: memref<16x128xf32, #tpu.memory_space<vmem>>, %arg10: memref<16x128xf32, #tpu.memory_space<vmem>>) attributes {dimension_semantics = [#tpu.dimension_semantics<parallel>, #tpu.dimension_semantics<arbitrary>], iteration_bounds = array<i64: 1, 1>, scalar_prefetch = 0 : i64, scratch_operands = 1 : i64, tpu.core_type = #tpu.core_type<tc>, window_params = [{transform_indices = @transform_0, window_bounds = array<i64: 16, 128>}, {transform_indices = @transform_1, window_bounds = array<i64: 16, 128>}, {pipeline_mode = #tpu.pipeline_mode<synchronous>, transform_indices = @transform_2, window_bounds = array<i64: 1, 128>}, {pipeline_mode = #tpu.pipeline_mode<synchronous>, transform_indices = @transform_3, window_bounds = array<i64: 1, 128>}, {transform_indices = @transform_4, window_bounds = array<i64: 128, 128>}, {pipeline_mode = #tpu.pipeline_mode<synchronous>, transform_indices = @transform_5, window_bounds = array<i64: 128, 128>}, {transform_indices = @transform_6, window_bounds = array<i64: 128, 128>}, {transform_indices = @transform_7, window_bounds = array<i64: 16, 128>}]} {
    %c0 = arith.constant 0 : index
    %c0_0 = arith.constant 0 : index
    %0 = vector.load %arg2[%c0, %c0_0] : memref<16x128xf32, #tpu.memory_space<vmem>>, vector<16x128xf32>
    %c0_1 = arith.constant 0 : index
    %c0_2 = arith.constant 0 : index
    %1 = vector.load %arg3[%c0_1, %c0_2] : memref<16x128xf32, #tpu.memory_space<vmem>>, vector<16x128xf32>
    %2 = arith.subf %0, %1 : vector<16x128xf32>
    %c0_i32 = arith.constant 0 : i32
    %3 = arith.cmpi eq, %arg1, %c0_i32 : i32
    %4 = arith.extui %3 : i1 to i32
    %c0_i32_3 = arith.constant 0 : i32
    %5 = arith.cmpi ne, %4, %c0_i32_3 : i32
    scf.if %5 {
      %cst_18 = arith.constant 0.000000e+00 : f32
      %25 = vector.broadcast %cst_18 : f32 to vector<16x128xf32>
      %c0_19 = arith.constant 0 : index
      %c0_20 = arith.constant 0 : index
      %26 = vector.load %arg10[%c0_19, %c0_20] : memref<16x128xf32, #tpu.memory_space<vmem>>, vector<16x128xf32>
      tpu.vector_store %arg10[%c0_19, %c0_20], %25 {strides = array<i32>} : memref<16x128xf32, #tpu.memory_space<vmem>>, vector<16x128xf32>,
    } else {
    }
    %c0_4 = arith.constant 0 : index
    %c0_5 = arith.constant 0 : index
    %6 = vector.load %arg4[%c0_4, %c0_5] : memref<1x128xf32, #tpu.memory_space<vmem>>, vector<1x128xf32>
    %7 = vector.broadcast %6 : vector<1x128xf32> to vector<16x128xf32>
    %8 = arith.mulf %2, %7 : vector<16x128xf32>
    %9 = arith.addf %1, %8 : vector<16x128xf32>
    %10 = arith.truncf %9 : vector<16x128xf32> to vector<16x128xbf16>
    %c0_6 = arith.constant 0 : index
    %c0_7 = arith.constant 0 : index
    %11 = vector.load %arg6[%c0_6, %c0_7] : memref<128x128xbf16, #tpu.memory_space<vmem>>, vector<128x128xbf16>
    %cst = arith.constant dense<0.000000e+00> : vector<16x128xf32>
    %12 = tpu.matmul %10, %11, %cst {dimension_numbers = #tpu.dot_dimension_numbers<[1], [0], [0], [1], [0, 0, 1, 1], [], []>} : vector<16x128xbf16>, vector<128x128xbf16>, vector<16x128xf32> -> vector<16x128xf32>
    %cst_8 = arith.constant 0.000000e+00 : f32
    %13 = vector.broadcast %cst_8 : f32 to vector<16x128xf32>
    %14 = arith.maximumf %12, %13 : vector<16x128xf32>
    %15 = arith.mulf %14, %14 : vector<16x128xf32>
    %16 = arith.truncf %15 : vector<16x128xf32> to vector<16x128xbf16>
    %c0_9 = arith.constant 0 : index
    %c0_10 = arith.constant 0 : index
    %17 = vector.load %arg10[%c0_9, %c0_10] : memref<16x128xf32, #tpu.memory_space<vmem>>, vector<16x128xf32>
    %c0_11 = arith.constant 0 : index
    %c0_12 = arith.constant 0 : index
    %18 = vector.load %arg8[%c0_11, %c0_12] : memref<128x128xbf16, #tpu.memory_space<vmem>>, vector<128x128xbf16>
    %cst_13 = arith.constant dense<0.000000e+00> : vector<16x128xf32>
    %19 = tpu.matmul %16, %18, %cst_13 {dimension_numbers = #tpu.dot_dimension_numbers<[1], [0], [0], [1], [0, 0, 1, 1], [], []>} : vector<16x128xbf16>, vector<128x128xbf16>, vector<16x128xf32> -> vector<16x128xf32>
    %20 = arith.addf %17, %19 : vector<16x128xf32>
    %c0_14 = arith.constant 0 : index
    %c0_15 = arith.constant 0 : index
    %21 = vector.load %arg10[%c0_14, %c0_15] : memref<16x128xf32, #tpu.memory_space<vmem>>, vector<16x128xf32>
    tpu.vector_store %arg10[%c0_14, %c0_15], %20 {strides = array<i32>} : memref<16x128xf32, #tpu.memory_space<vmem>>, vector<16x128xf32>,
    %c0_i32_16 = arith.constant 0 : i32
    %22 = arith.cmpi eq, %arg1, %c0_i32_16 : i32
    %23 = arith.extui %22 : i1 to i32
    %c0_i32_17 = arith.constant 0 : i32
    %24 = arith.cmpi ne, %23, %c0_i32_17 : i32
    scf.if %24 {
      %c0_18 = arith.constant 0 : index
      %c0_19 = arith.constant 0 : index
      %25 = vector.load %arg5[%c0_18, %c0_19] : memref<1x128xf32, #tpu.memory_space<vmem>>, vector<1x128xf32>
      %26 = vector.broadcast %25 : vector<1x128xf32> to vector<16x128xf32>
      %27 = arith.mulf %2, %26 : vector<16x128xf32>
      %28 = arith.addf %1, %27 : vector<16x128xf32>
      %29 = arith.truncf %28 : vector<16x128xf32> to vector<16x128xbf16>
      %c0_20 = arith.constant 0 : index
      %c0_21 = arith.constant 0 : index
      %30 = vector.load %arg7[%c0_20, %c0_21] : memref<128x128xbf16, #tpu.memory_space<vmem>>, vector<128x128xbf16>
      %cst_22 = arith.constant dense<0.000000e+00> : vector<16x128xf32>
      %31 = tpu.matmul %29, %30, %cst_22 {dimension_numbers = #tpu.dot_dimension_numbers<[1], [0], [0], [1], [0, 0, 1, 1], [], []>} : vector<16x128xbf16>, vector<128x128xbf16>, vector<16x128xf32> -> vector<16x128xf32>
      %32 = arith.negf %31 : vector<16x128xf32>
      %33 = math.exp %32 : vector<16x128xf32>
      %cst_23 = arith.constant 1.000000e+00 : f32
      %34 = vector.broadcast %cst_23 : f32 to vector<16x128xf32>
      %35 = arith.addf %34, %33 : vector<16x128xf32>
      %36 = arith.divf %34, %35 : vector<16x128xf32>
      %c0_24 = arith.constant 0 : index
      %c0_25 = arith.constant 0 : index
      %37 = vector.load %arg10[%c0_24, %c0_25] : memref<16x128xf32, #tpu.memory_space<vmem>>, vector<16x128xf32>
      %38 = arith.mulf %36, %37 : vector<16x128xf32>
      %c0_26 = arith.constant 0 : index
      %c0_27 = arith.constant 0 : index
      %39 = vector.load %arg9[%c0_26, %c0_27] : memref<16x128xf32, #tpu.memory_space<vmem>>, vector<16x128xf32>
      tpu.vector_store %arg9[%c0_26, %c0_27], %38 {strides = array<i32>} : memref<16x128xf32, #tpu.memory_space<vmem>>, vector<16x128xf32>,
    } else {
    }
    return
  }
  func.func @transform_0(%arg0: i32, %arg1: i32) -> (i32, i32) {
    %c0_i32 = arith.constant 0 : i32
    %c0_i32_0 = arith.constant 0 : i32
    return %arg0, %c0_i32 : i32, i32
  }
  func.func @transform_1(%arg0: i32, %arg1: i32) -> (i32, i32) {
    %c0_i32 = arith.constant 0 : i32
    %c0_i32_0 = arith.constant 0 : i32
    return %arg0, %c0_i32 : i32, i32
  }
  func.func @transform_2(%arg0: i32, %arg1: i32) -> (i32, i32) {
    %c0_i32 = arith.constant 0 : i32
    %c0_i32_0 = arith.constant 0 : i32
    %c0_i32_1 = arith.constant 0 : i32
    return %c0_i32, %c0_i32_0 : i32, i32
  }
  func.func @transform_3(%arg0: i32, %arg1: i32) -> (i32, i32) {
    %c0_i32 = arith.constant 0 : i32
    %c0_i32_0 = arith.constant 0 : i32
    %c0_i32_1 = arith.constant 0 : i32
    return %c0_i32, %c0_i32_0 : i32, i32
  }
  func.func @transform_4(%arg0: i32, %arg1: i32) -> (i32, i32) {
    %c0_i32 = arith.constant 0 : i32
    %c0_i32_0 = arith.constant 0 : i32
    return %c0_i32, %arg1 : i32, i32
  }
  func.func @transform_5(%arg0: i32, %arg1: i32) -> (i32, i32) {
    %c0_i32 = arith.constant 0 : i32
    %c0_i32_0 = arith.constant 0 : i32
    %c0_i32_1 = arith.constant 0 : i32
    return %c0_i32, %c0_i32_0 : i32, i32
  }
  func.func @transform_6(%arg0: i32, %arg1: i32) -> (i32, i32) {
    %c0_i32 = arith.constant 0 : i32
    %c0_i32_0 = arith.constant 0 : i32
    return %arg1, %c0_i32 : i32, i32
  }
  func.func @transform_7(%arg0: i32, %arg1: i32) -> (i32, i32) {
    %c0_i32 = arith.constant 0 : i32
    %c0_i32_0 = arith.constant 0 : i32
    return %arg0, %c0_i32 : i32, i32
  }
}

</mosaic_0001>

<bundles_post_ra>
// kernel: tpu_custom_call.1
= control target key start
LH: loop header
LB: loop body
LE: loop exit
PB: predicated region body
PF: predicated region fallthrough
CT: control target
= control target key end

     0   :  { %12 = vsyncpa [#allocation4], 0  ;;  %s985_s0 = inlined_call_operand.hbm [shape: f32[16,128], index: 0, kind: input, shape index: {}]   ;;  %s986_s1 = inlined_call_operand.hbm [shape: f32[16,128], index: 1, kind: input, shape index: {}]   ;;  %s987_s2 = inlined_call_operand.vmem [shape: f32[1,128], index: 2, kind: input, shape index: {}]   ;;  %s988_s3 = inlined_call_operand.vmem [shape: f32[1,128], index: 3, kind: input, shape index: {}]   ;;  %s989_s4 = inlined_call_operand.hbm [shape: bf16[128,128], index: 4, kind: input, shape index: {}]   ;;  %s990_s5 = inlined_call_operand.hbm [shape: bf16[128,128], index: 5, kind: input, shape index: {}]   ;;  %s991_s6 = inlined_call_operand.hbm [shape: bf16[128,128], index: 6, kind: input, shape index: {}]   ;;  %s992_s7 = inlined_call_operand.hbm [shape: f32[16,128], index: 7, kind: output, shape index: {}]  }
   0x1   :  { %13 = vsyncpa [#allocation7], 0 }
   0x2   :  { %14 = vsyncpa [#allocation10], 0 }
   0x3   :  { %15 = vsyncpa [#allocation5], 0  ;;  %s797_s24 = smov [#allocation6]   ;;  %s657_s28 = scalar_lea.hbm %s986_s1, 256 }
   0x4   :  { %s33_s25 = sshll.u32 %s797_s24, 4  ;;  %p658_p0 = scmp.ne.s32.totalorder %s986_s1, %s657_s28  ;;  %s34_s25 = int_to_ptr.vmem [resolvable:$true] %s33_s25 }
   0x5   :  { %p661_p1 = scmp.lt.u32.totalorder %s657_s28, %s986_s1 }
   0x7   :  { %p663_p2 = pnand %p661_p1, %p658_p0 }
   0x9   :  { %666 = shalt.err (!%p663_p2)
}
   0xa   :  { %s667_s10 = scalar_lea.vmem %s34_s25, 256  ;;  %p672_p4 = scmp.lt.s32.totalorder %s34_s25, %s34_s25 }
   0xb   :  { %p668_p3 = scmp.ne.s32.totalorder %s34_s25, %s667_s10  ;;  %p673_p5 = scmp.lt.s32.totalorder %s667_s10, %s667_s10 }
   0xd   :  { %p674_p6 = por %p673_p5, %p672_p4 }
   0xf   :  { %p675_p7 = pnand %p674_p6, %p668_p3 }
  0x11   :  { %678 = shalt.err (!%p675_p7)
}
  0x12   :  { %s798_s11 = smov 128   ;;  %s799_s12 = smov 8  }
  0x13   :  { %39 = dma.hbm_to_vmem [thread:$0]  %s986_s1, 256, %s34_s25, [#allocation7], %s798_s11, %s798_s11, %s799_s12  }
  0x14   :  { %s800_s15 = smov [#allocation9]   ;;  %s801_s17 = smov [#allocation3]  }
  0x15   :  { %s61_s16 = sshll.u32 %s800_s15, 4  ;;  %s21_s18 = sshll.u32 %s801_s17, 4  ;;  %s62_s16 = int_to_ptr.vmem [resolvable:$true] %s61_s16  ;;  %s22_s18 = int_to_ptr.vmem [resolvable:$true] %s21_s18 }
  0x16   :  { %s679_s21 = scalar_lea.hbm %s990_s5, 1024 }
  0x17   :  { %p680_p8 = scmp.ne.s32.totalorder %s990_s5, %s679_s21  ;;  %p683_p9 = scmp.lt.u32.totalorder %s679_s21, %s990_s5 }
  0x19   :  { %p685_p10 = pnand %p683_p9, %p680_p8 }
  0x1b   :  { %688 = shalt.err (!%p685_p10)
}
  0x1c   :  { %s689_s1 = scalar_lea.vmem %s62_s16, 1024  ;;  %p694_p12 = scmp.lt.s32.totalorder %s62_s16, %s62_s16 }
  0x1d   :  { %p690_p11 = scmp.ne.s32.totalorder %s62_s16, %s689_s1  ;;  %p695_p13 = scmp.lt.s32.totalorder %s689_s1, %s689_s1 }
  0x1f   :  { %p696_p0 = por %p695_p13, %p694_p12 }
  0x21   :  { %p697_p1 = pnand %p696_p0, %p690_p11 }
  0x23   :  { %700 = shalt.err (!%p697_p1)
}
  0x24   :  { %s802_s25 = smov 64   ;;  %s803_s27 = smov 4  }
  0x25   :  { %67 = dma.hbm_to_vmem [thread:$0]  %s990_s5, 1024, %s62_s16, [#allocation10], %s802_s25, %s802_s25, %s803_s27  }
  0x26   :  { %s701_s9 = scalar_lea.hbm %s985_s0, 256 }
  0x27   :  { %p702_p2 = scmp.ne.s32.totalorder %s985_s0, %s701_s9  ;;  %p705_p3 = scmp.lt.u32.totalorder %s701_s9, %s985_s0 }
  0x29   :  { %p707_p4 = pnand %p705_p3, %p702_p2 }
  0x2b   :  { %710 = shalt.err (!%p707_p4)
}
  0x2c   :  { %s711_s17 = scalar_lea.vmem %s22_s18, 256  ;;  %p716_p6 = scmp.lt.s32.totalorder %s22_s18, %s22_s18 }
  0x2d   :  { %p712_p5 = scmp.ne.s32.totalorder %s22_s18, %s711_s17  ;;  %p717_p7 = scmp.lt.s32.totalorder %s711_s17, %s711_s17 }
  0x2f   :  { %p718_p8 = por %p717_p7, %p716_p6 }
  0x31   :  { %p719_p9 = pnand %p718_p8, %p712_p5 }
  0x33   :  { %722 = shalt.err (!%p719_p9)
}
  0x34   :  { %27 = dma.hbm_to_vmem [thread:$0]  %s985_s0, 256, %s22_s18, [#allocation4], %s798_s11, %s798_s11, %s799_s12  }
  0x35   :  { %s804_s19 = smov [#allocation8]   ;;  %s805_s21 = smov [#allocation11]  }
  0x36   :  { %s49_s20 = sshll.u32 %s804_s19, 4  ;;  %s73_s22 = sshll.u32 %s805_s21, 4  ;;  %s50_s20 = int_to_ptr.vmem [resolvable:$true] %s49_s20  ;;  %s74_s22 = int_to_ptr.vmem [resolvable:$true] %s73_s22 }
  0x37   :  { %s723_s26 = scalar_lea.hbm %s989_s4, 1024 }
  0x38   :  { %p724_p10 = scmp.ne.s32.totalorder %s989_s4, %s723_s26  ;;  %p727_p11 = scmp.lt.u32.totalorder %s723_s26, %s989_s4 }
  0x3a   :  { %p729_p12 = pnand %p727_p11, %p724_p10 }
  0x3c   :  { %732 = shalt.err (!%p729_p12)
}
  0x3d   :  { %s733_s0 = scalar_lea.vmem %s50_s20, 1024  ;;  %p738_p0 = scmp.lt.s32.totalorder %s50_s20, %s50_s20 }
  0x3e   :  { %p734_p13 = scmp.ne.s32.totalorder %s50_s20, %s733_s0  ;;  %p739_p1 = scmp.lt.s32.totalorder %s733_s0, %s733_s0 }
  0x40   :  { %p740_p2 = por %p739_p1, %p738_p0 }
  0x42   :  { %p741_p3 = pnand %p740_p2, %p734_p13 }
  0x44   :  { %744 = shalt.err (!%p741_p3)
}
  0x45   :  { %55 = dma.hbm_to_vmem [thread:$0]  %s989_s4, 1024, %s50_s20, [#allocation7], %s802_s25, %s802_s25, %s803_s27  }
  0x46   :  { %s745_s13 = scalar_lea.hbm %s991_s6, 1024 }
  0x47   :  { %p746_p4 = scmp.ne.s32.totalorder %s991_s6, %s745_s13  ;;  %p749_p5 = scmp.lt.u32.totalorder %s745_s13, %s991_s6 }
  0x49   :  { %p751_p6 = pnand %p749_p5, %p746_p4 }
  0x4b   :  { %754 = shalt.err (!%p751_p6)
}
  0x4c   :  { %s755_s16 = scalar_lea.vmem %s74_s22, 1024  ;;  %p760_p8 = scmp.lt.s32.totalorder %s74_s22, %s74_s22 }
  0x4d   :  { %p756_p7 = scmp.ne.s32.totalorder %s74_s22, %s755_s16  ;;  %p761_p9 = scmp.lt.s32.totalorder %s755_s16, %s755_s16 }
  0x4f   :  { %p762_p10 = por %p761_p9, %p760_p8 }
  0x51   :  { %p763_p11 = pnand %p762_p10, %p756_p7 }
  0x53   :  { %766 = shalt.err (!%p763_p11)
}
  0x54   :  { %79 = dma.hbm_to_vmem [thread:$0]  %s991_s6, 1024, %s74_s22, [#allocation10], %s802_s25, %s802_s25, %s803_s27  }
  0x55   :  { %789 = dma.done.wait [#allocation4], 256  }
  0x56   :  { %790 = vsyncadd [#allocation4], 4294967040 }
  0x57   :  { %791 = dma.done.wait [#allocation7], 1280  }
  0x58   :  { %792 = vsyncadd [#allocation7], 4294966016 }
  0x59   :  { %793 = dma.done.wait [#allocation10], 2048  }
  0x5a   :  { %794 = vsyncadd [#allocation10], 4294965248  ;;  %v806_v0 = vmov 0.0   ;;  %vm807_vm0 = vmmov 0   ;;  %v625_v1 = vld [vmem:[#allocation8] sm:$0xff]   ;;  %v626_v2 = vld [vmem:[#allocation8 + $0x8] sm:$0xff]  }
  0x5b   :  { %553 = vmatprep.subr.bf16.mxu0 %v806_v0  ;;  %569 = vmatprep.mubr.msk.bf16.mxu0 %vm807_vm0, %v806_v0  ;;  %v627_v3 = vld [vmem:[#allocation8 + $0x10] sm:$0xff]   ;;  %v628_v4 = vld [vmem:[#allocation8 + $0x18] sm:$0xff]   ;;  %v629_v5 = vld [vmem:[#allocation8 + $0x20] sm:$0xff]  }
  0x5c   :  { %573 = vmatprep.subr.bf16.mxu1 %v806_v0  ;;  %589 = vmatprep.mubr.msk.bf16.mxu1 %vm807_vm0, %v806_v0  ;;  %v96_v6 = vld [vmem:[#allocation3] sm:$0xff]  ;;  %v97_v7 = vld [vmem:[#allocation3 + $0x8] sm:$0xff]  ;;  %v933_v8 = vld [vmem:[#allocation6] sm:$0xff] }
  0x5d   :  { %554 = vmatpush3.bf16.msra.mxu0 %v625_v1  ;;  %v935_v9 = vld [vmem:[#allocation6 + $0x8] sm:$0xff]  ;;  %v630_v10 = vld [vmem:[#allocation8 + $0x28] sm:$0xff]   ;;  %v100_v11 = vsub.f32 %v96_v6, %v933_v8  ;;  %v498_v13 = vld [vmem:[%s987_s2] ss:$0 sm:$0xff] }
  0x5e   :  { %555 = vmatprep.subr.bf16.mxu0 %v806_v0  ;;  %v101_v12 = vsub.f32 %v97_v7, %v935_v9  ;;  %v641_v14 = vld [vmem:[#allocation11] sm:$0xff]   ;;  %v642_v15 = vld [vmem:[#allocation11 + $0x8] sm:$0xff]   ;;  %v631_v18 = vld [vmem:[#allocation8 + $0x30] sm:$0xff]  }
  0x5f   :  { %574 = vmatpush3.bf16.msra.mxu1 %v641_v14  ;;  %v115_v16 = vmul.f32 %v498_v13, %v100_v11  ;;  %v643_v19 = vld [vmem:[#allocation11 + $0x10] sm:$0xff]   ;;  %v632_v22 = vld [vmem:[#allocation8 + $0x38] sm:$0xff]   ;;  %v633_v25 = vld [vmem:[#allocation9] sm:$0xff]  }
  0x60   :  { %v116_v17 = vmul.f32 %v498_v13, %v101_v12  ;;  %575 = vmatprep.subr.bf16.mxu1 %v806_v0  ;;  %v644_v23 = vld [vmem:[#allocation11 + $0x18] sm:$0xff]   ;;  %v645_v26 = vld [vmem:[#allocation11 + $0x20] sm:$0xff]   ;;  %v634_v27 = vld [vmem:[#allocation9 + $0x8] sm:$0xff]  }
  0x61   :  { %556 = vmatpush3.bf16.msra.mxu0 %v626_v2  ;;  %v117_v20 = vadd.f32 %v115_v16, %v933_v8  ;;  %v646_v28 = vld [vmem:[#allocation11 + $0x28] sm:$0xff]   ;;  %v635_v29 = vld [vmem:[#allocation9 + $0x10] sm:$0xff]   ;;  %v636_v30 = vld [vmem:[#allocation9 + $0x18] sm:$0xff]  }
  0x62   :  { %557 = vmatprep.subr.bf16.mxu0 %v806_v0  ;;  %v118_v21 = vadd.f32 %v116_v17, %v935_v9  ;;  %v637_v31 = vld [vmem:[#allocation9 + $0x20] sm:$0xff]   ;;  %v638_v32 = vld [vmem:[#allocation9 + $0x28] sm:$0xff]   ;;  %v639_v36 = vld [vmem:[#allocation9 + $0x30] sm:$0xff]  }
  0x63   :  { %576 = vmatpush3.bf16.msra.mxu1 %v642_v15  ;;  %v515_v33 = vld [vmem:[%s988_s3] ss:$0 sm:$0xff]  ;;  %v640_v39 = vld [vmem:[#allocation9 + $0x38] sm:$0xff]   ;;  %v647_v41 = vld [vmem:[#allocation11 + $0x30] sm:$0xff]   ;;  %s808_s3 = smov [#allocation12]  }
  0x64   :  { %577 = vmatprep.subr.bf16.mxu1 %v806_v0  ;;  %v119_v24 = vpack.c.bf16 %v118_v21, %v117_v20  ;;  %v351_v34 = vmul.f32 %v515_v33, %v100_v11  ;;  %v352_v35 = vmul.f32 %v515_v33, %v101_v12  ;;  %v648_v42 = vld [vmem:[#allocation11 + $0x38] sm:$0xff]   ;;  %s484_s20 = sshll.u32 %s808_s3, 4  ;;  %s485_s20 = int_to_ptr.vmem [resolvable:$true] %s484_s20 }
  0x65   :  { %558 = vmatpush3.bf16.msra.mxu0 %v627_v3  ;;  %s767_s21 = scalar_lea.vmem %s485_s20, 256  ;;  %p772_p13 = scmp.lt.s32.totalorder %s485_s20, %s485_s20 }
  0x66   :  { %559 = vmatprep.subr.bf16.mxu0 %v806_v0  ;;  %v353_v37 = vadd.f32 %v351_v34, %v933_v8  ;;  %v354_v38 = vadd.f32 %v352_v35, %v935_v9  ;;  %p768_p12 = scmp.ne.s32.totalorder %s485_s20, %s767_s21  ;;  %p773_p0 = scmp.lt.s32.totalorder %s767_s21, %s767_s21 }
  0x67   :  { %578 = vmatpush3.bf16.msra.mxu1 %v643_v19 }
  0x68   :  { %579 = vmatprep.subr.bf16.mxu1 %v806_v0  ;;  %v355_v40 = vpack.c.bf16 %v354_v38, %v353_v37  ;;  %p774_p1 = por %p773_p0, %p772_p13 }
  0x69   :  { %560 = vmatpush3.bf16.msra.mxu0 %v628_v4 }
  0x6a   :  { %561 = vmatprep.subr.bf16.mxu0 %v806_v0  ;;  %p775_p2 = pnand %p774_p1, %p768_p12 }
  0x6b   :  { %580 = vmatpush3.bf16.msra.mxu1 %v644_v23 }
  0x6c   :  { %581 = vmatprep.subr.bf16.mxu1 %v806_v0 }
  0x6d   :  { %562 = vmatpush3.bf16.msra.mxu0 %v629_v5 }
  0x6e   :  { %563 = vmatprep.subr.bf16.mxu0 %v806_v0 }
  0x6f   :  { %582 = vmatpush3.bf16.msra.mxu1 %v645_v26 }
  0x70   :  { %583 = vmatprep.subr.bf16.mxu1 %v806_v0 }
  0x71   :  { %564 = vmatpush3.bf16.msra.mxu0 %v630_v10 }
  0x72   :  { %565 = vmatprep.subr.bf16.mxu0 %v806_v0 }
  0x73   :  { %584 = vmatpush3.bf16.msra.mxu1 %v646_v28 }
  0x74   :  { %585 = vmatprep.subr.bf16.mxu1 %v806_v0 }
  0x75   :  { %566 = vmatpush3.bf16.msra.mxu0 %v631_v18 }
  0x76   :  { %567 = vmatprep.subr.bf16.mxu0 %v806_v0 }
  0x77   :  { %586 = vmatpush3.bf16.msra.mxu1 %v647_v41 }
  0x78   :  { %587 = vmatprep.subr.bf16.mxu1 %v806_v0 }
  0x79   :  { %568 = vmatpush3.bf16.msra.mxu0 %v632_v22 }
  0x7a   :  { %593 = vmatprep.subr.bf16.mxu0 %v806_v0 }
  0x7b   :  { %588 = vmatpush3.bf16.msra.mxu1 %v648_v42 }
  0x7c   :  { %570 = vmatmul.mubr.bf16.vlgmr.msra.gmra.mrb[0].mxu0 %v119_v24 }
  0x7d   :  { %594 = vmatpush3.bf16.msra.mxu0 %v633_v25  ;;  %609 = vmatprep.mubr.msk.bf16.mxu0 %vm807_vm0, %v806_v0 }
  0x7e   :  { %595 = vmatprep.subr.bf16.mxu0 %v806_v0 }
  0x81   :  { %596 = vmatpush3.bf16.msra.mxu0 %v634_v27 }
  0x82   :  { %597 = vmatprep.subr.bf16.mxu0 %v806_v0 }
  0x85   :  { %598 = vmatpush3.bf16.msra.mxu0 %v635_v29 }
  0x86   :  { %599 = vmatprep.subr.bf16.mxu0 %v806_v0 }
  0x89   :  { %600 = vmatpush3.bf16.msra.mxu0 %v636_v30 }
  0x8a   :  { %601 = vmatprep.subr.bf16.mxu0 %v806_v0 }
  0x8d   :  { %602 = vmatpush3.bf16.msra.mxu0 %v637_v31 }
  0x8e   :  { %603 = vmatprep.subr.bf16.mxu0 %v806_v0 }
  0x91   :  { %604 = vmatpush3.bf16.msra.mxu0 %v638_v32 }
  0x92   :  { %605 = vmatprep.subr.bf16.mxu0 %v806_v0 }
  0x95   :  { %606 = vmatpush3.bf16.msra.mxu0 %v639_v36 }
  0x96   :  { %607 = vmatprep.subr.bf16.mxu0 %v806_v0 }
  0x99   :  { %608 = vmatpush3.bf16.msra.mxu0 %v640_v39 }
  0x9c   :  { %610 = vmatmul.mubr.bf16.vlgmr.msra.gmra.mrb[4].mxu0 %v355_v40 }
 0x14f   :  { %v218_v43 = vpop.f32.mrb[0].mxu0 }
 0x150   :  { %v225_v44 = vmax.f32 %v218_v43, 0.0  ;;  %v571_v45 = vpop.f32.mrb[1].mxu0 }
 0x151   :  { %v221_v46 = vpop.f32.mrb[2].mxu0 }
 0x152   :  { %v226_v47 = vmax.f32 %v221_v46, 0.0  ;;  %v572_v48 = vpop.f32.mrb[3].mxu0  ;;  %v227_v49 = vmul.f32 %v225_v44, %v225_v44 }
 0x154   :  { %v228_v50 = vmul.f32 %v226_v47, %v226_v47 }
 0x156   :  { %v229_v51 = vpack.c.bf16 %v228_v50, %v227_v49 }
 0x158   :  { %590 = vmatmul.mubr.bf16.vlgmr.msra.gmra.mrb[0].mxu1 %v229_v51 }
 0x16f   :  { %v454_v52 = vpop.f32.mrb[4].mxu0 }
 0x170   :  { %v611_v53 = vpop.f32.mrb[5].mxu0  ;;  %v524_v56 = vmul.f32 -1.442695, %v454_v52 }
 0x171   :  { %v457_v54 = vpop.f32.mrb[6].mxu0 }
 0x172   :  { %v612_v55 = vpop.f32.mrb[7].mxu0  ;;  %649 = vpow2.f32 %v524_v56  ;;  %v525_v57 = vmul.f32 -1.442695, %v457_v54 }
 0x174   :  { %651 = vpow2.f32 %v525_v57 }
 0x17c   :  { %v650_v58 = vpop.eup %649 }
 0x17d   :  { %v467_v59 = vadd.f32 1.0, %v650_v58 }
 0x17e   :  { %v652_v60 = vpop.eup %651 }
 0x17f   :  { %653 = vrcp.f32 %v467_v59  ;;  %v468_v61 = vadd.f32 1.0, %v652_v60 }
 0x181   :  { %655 = vrcp.f32 %v468_v61 }
 0x189   :  { %v654_v62 = vpop.eup %653 }
 0x18b   :  { %v656_v2 = vpop.eup %655 }
 0x22b   :  { %v330_v63 = vpop.f32.mrb[0].mxu1 }
 0x22c   :  { %v475_v0 = vmul.f32 %v654_v62, %v330_v63  ;;  %v591_v1 = vpop.f32.mrb[1].mxu1 }
 0x22d   :  { %v333_v3 = vpop.f32.mrb[2].mxu1 }
 0x22e   :  { %477 = vst [vmem:[#allocation12] sm:$0xff] %v475_v0  ;;  %v476_v4 = vmul.f32 %v656_v2, %v333_v3  ;;  %v592_v5 = vpop.f32.mrb[3].mxu1 }
 0x230   :  { %478 = vst [vmem:[#allocation12 + $0x8] sm:$0xff] %v476_v4 }
 0x231   :  { %778 = shalt.err (!%p775_p2)
}
 0x232   :  { %s779_s24 = scalar_lea.hbm %s992_s7, 256 }
 0x233   :  { %p780_p3 = scmp.ne.s32.totalorder %s992_s7, %s779_s24  ;;  %p783_p4 = scmp.lt.u32.totalorder %s779_s24, %s992_s7 }
 0x235   :  { %p785_p5 = pnand %p783_p4, %p780_p3 }
 0x237   :  { %788 = shalt.err (!%p785_p5)
}
 0x238   :  { %490 = dma.vmem_to_hbm [thread:$0]  %s485_s20, 256, %s992_s7, [#allocation5], %s798_s11, %s798_s11, %s799_s12  }
 0x239   :  { %795 = dma.done.wait [#allocation5], 256  }
 0x23a   :  { %796 = vsyncadd [#allocation5], 4294967040 }
 0x23b   :  { %494 = vsyncpa [#allocation4], 1 }
 0x23c   :  { %495 = vsyncpa [#allocation7], 1 }
 0x23d   :  { %496 = vsyncpa [#allocation10], 1 }
 0x23e   :  { %497 = vsyncpa [#allocation5], 1 }

</bundles_post_ra>
